<compile_context>
chip_gen: v5e
topology: v5e:2x2
jax: 0.10.0
libtpu: 0.0.40
codegen_flags: <defaults>
</compile_context>

<pallas_src>
import jax
import jax.numpy as jnp
from jax.experimental import pallas as pl
from jax.experimental.pallas import tpu as pltpu

_LANE = 128


def _mish_kernel(x_ref, o_ref):
    # Load in native dtype; do the math in f32 (required on v5e, cheap everywhere).
    x = x_ref[...].astype(jnp.float32)
    # tanh(softplus(x)) == 1 - 2 / ((1 + e^x)^2 + 1)
    #   * one EUP transcendental (exp) + one divide instead of exp/log1p/tanh,
    #     so the single EUP slot never becomes the binding unit on v7x.
    #   * inf-safe: e^x -> inf  => y -> x ;   e^x -> 0 => y -> 0
    e = jnp.exp(x)
    d = (1.0 + e) * (1.0 + e) + 1.0
    y = x * (1.0 - 2.0 / d)
    o_ref[...] = y.astype(o_ref.dtype)


def mish_pallas(x):
    """Elementwise Mish via a Pallas TPU kernel. Accepts any shape/dtype."""
    orig_shape = x.shape
    orig_dtype = x.dtype

    flat = x.reshape(-1)          # free (metadata-only) reshape, no astype
    n = flat.shape[0]

    # Only pad the (rare) sub-128 tail needed to form the (rows, 128) slab.
    rem = n % _LANE
    if rem != 0:
        flat = jnp.pad(flat, (0, _LANE - rem))
    rows = flat.shape[0] // _LANE
    x2d = flat.reshape(rows, _LANE)

    # ~2 MiB (f32) / ~1 MiB (bf16) input block: amortizes the ~0.35 us
    # per-grid-step overhead; double-buffered in+out is ~8 MiB f32, well under
    # the scoped-VMEM default on v5e/v6e/v7x.
    target_block_rows = 4096
    if rows > target_block_rows:
        block_rows = target_block_rows
    else:
        # Small inputs: split into >=2 grid steps when possible so the grid can
        # be sharded across both TensorCores on v7x (block rows multiple of 8).
        half = (((rows + 1) // 2) + 7) // 8 * 8
        block_rows = half if half < rows else rows

    grid = (pl.cdiv(rows, block_rows),)  # ragged last block is masked by Pallas

    out2d = pl.pallas_call(
        _mish_kernel,
        out_shape=jax.ShapeDtypeStruct((rows, _LANE), orig_dtype),
        grid_spec=pltpu.PrefetchScalarGridSpec(
            num_scalar_prefetch=0,
            grid=grid,
            in_specs=[pl.BlockSpec((block_rows, _LANE), lambda i: (i, 0))],
            out_specs=pl.BlockSpec((block_rows, _LANE), lambda i: (i, 0)),
        ),
        compiler_params=pltpu.CompilerParams(
            dimension_semantics=("parallel",)
        ),
    )(x2d)

    out = out2d.reshape(-1)
    if rem != 0:
        out = out[:n]
    return out.reshape(orig_shape)


def mish_reference(x):
    x32 = x.astype(jnp.float32)
    sp = jnp.maximum(x32, 0.0) + jnp.log1p(jnp.exp(-jnp.abs(x32)))
    return (x32 * jnp.tanh(sp)).astype(x.dtype)


if __name__ == "__main__":
    key = jax.random.PRNGKey(0)
    # NCHW, like the PyTorch module would receive.
    x = jax.random.normal(key, (2, 4, 16, 16), dtype=jnp.float32) * 3.0

    y = mish_pallas(x)
    jax.block_until_ready(y)

    y_ref = mish_reference(x)
    assert y.shape == x.shape and y.dtype == x.dtype
    assert jnp.allclose(y, y_ref, atol=1e-5, rtol=1e-5), (
        float(jnp.max(jnp.abs(y - y_ref)))
    )

    print("KERNEL_OK")
</pallas_src>

<mosaic_0001>
module attributes {stable_mosaic.version = 11 : i64} {
  func.func @_mish_kernel(%arg0: i32, %arg1: memref<8x128xf32, #tpu.memory_space<vmem>>, %arg2: memref<8x128xf32, #tpu.memory_space<vmem>>) attributes {dimension_semantics = [#tpu.dimension_semantics<parallel>], iteration_bounds = array<i64: 2>, scalar_prefetch = 0 : i64, scratch_operands = 0 : i64, tpu.core_type = #tpu.core_type<tc>, window_params = [{transform_indices = @transform_0, window_bounds = array<i64: 8, 128>}, {transform_indices = @transform_1, window_bounds = array<i64: 8, 128>}]} {
    %c0 = arith.constant 0 : index
    %c0_0 = arith.constant 0 : index
    %0 = vector.load %arg1[%c0, %c0_0] : memref<8x128xf32, #tpu.memory_space<vmem>>, vector<8x128xf32>
    %1 = math.exp %0 : vector<8x128xf32>
    %cst = arith.constant 1.000000e+00 : f32
    %2 = vector.broadcast %cst : f32 to vector<8x128xf32>
    %3 = arith.addf %2, %1 : vector<8x128xf32>
    %cst_1 = arith.constant 1.000000e+00 : f32
    %4 = vector.broadcast %cst_1 : f32 to vector<8x128xf32>
    %5 = arith.addf %4, %1 : vector<8x128xf32>
    %6 = arith.mulf %3, %5 : vector<8x128xf32>
    %cst_2 = arith.constant 1.000000e+00 : f32
    %7 = vector.broadcast %cst_2 : f32 to vector<8x128xf32>
    %8 = arith.addf %6, %7 : vector<8x128xf32>
    %cst_3 = arith.constant 2.000000e+00 : f32
    %9 = vector.broadcast %cst_3 : f32 to vector<8x128xf32>
    %10 = arith.divf %9, %8 : vector<8x128xf32>
    %cst_4 = arith.constant 1.000000e+00 : f32
    %11 = vector.broadcast %cst_4 : f32 to vector<8x128xf32>
    %12 = arith.subf %11, %10 : vector<8x128xf32>
    %13 = arith.mulf %0, %12 : vector<8x128xf32>
    %c0_5 = arith.constant 0 : index
    %c0_6 = arith.constant 0 : index
    %14 = vector.load %arg2[%c0_5, %c0_6] : memref<8x128xf32, #tpu.memory_space<vmem>>, vector<8x128xf32>
    tpu.vector_store %arg2[%c0_5, %c0_6], %13 {strides = array<i32>} : memref<8x128xf32, #tpu.memory_space<vmem>>, vector<8x128xf32>,
    return
  }
  func.func @transform_0(%arg0: i32) -> (i32, i32) {
    %c0_i32 = arith.constant 0 : i32
    %c0_i32_0 = arith.constant 0 : i32
    return %arg0, %c0_i32 : i32, i32
  }
  func.func @transform_1(%arg0: i32) -> (i32, i32) {
    %c0_i32 = arith.constant 0 : i32
    %c0_i32_0 = arith.constant 0 : i32
    return %arg0, %c0_i32 : i32, i32
  }
}

</mosaic_0001>

<bundles_post_ra>
// kernel: tpu_custom_call.1
= control target key start
LH: loop header
LB: loop body
LE: loop exit
PB: predicated region body
PF: predicated region fallthrough
CT: control target
= control target key end

     0   :  { %6 = vsyncpa [#allocation3], 0  ;;  %s541_s0 = inlined_call_operand.hbm [shape: f32[16,128], index: 0, kind: input, shape index: {}]   ;;  %s542_s1 = inlined_call_operand.hbm [shape: f32[16,128], index: 1, kind: output, shape index: {}]  }
   0x1   :  { %8 = vsyncpa [#allocation3 + $0x1], 0 }
   0x2   :  { %9 = vsyncpa [#allocation4], 0 }
   0x3   :  { %11 = vsyncpa [#allocation4 + $0x1], 0  ;;  %s414_s6 = smov 0   ;;  %s416_s7 = smov 0  }
   0x4   :  { %s418_s8 = smov 0   ;;  %s420_s9 = smov 0  }
   0x5 LB: > { %s435_s10 = sadd.s32 4294967295, %s402_s9   ;;  %s244_s11 = sadd.s32 4294967294, %s402_s9   ;;  %s402_s9 = sphi %s420_s9, %s552_s9   ;;  %s398_s8 = sphi %s418_s8, %s551_s8   ;;  %s394_s7 = sphi %s416_s7, %s550_s7   ;;  %s390_s6 = sphi %s414_s6, %s549_s6  }
   0x6   : > { %s439_s12 = sadd.s32 1, %s402_s9   ;;  %s24_s13 = sadd.s32 1, %s398_s8 }
   0x7   : > { %s21_s14 = ssub.s32 %s402_s9, %s439_s12  ;;  %p31_p0 = scmp.ne.s32.totalorder %s398_s8, %s394_s7 }
   0x8   : > { %p22_p1 = scmp.eq.s32.totalorder %s21_s14, 0  ;;  %p32_p2 = scmp.eq.s32.totalorder %s402_s9, 0 }
   0x9   : > { %p37_p3 = scmp.ne.s32.totalorder %s394_s7, %s390_s6  ;;  %p38_p4 = scmp.eq.s32.totalorder %s435_s10, 0 }
   0xa   : > { %s451_s15 = scalar_select %p22_p1, %s398_s8, %s24_s13  }
   0xb   : > { %p453_p5 = por %p32_p2, %p31_p0  ;;  %p457_p6 = por %p38_p4, %p37_p3 }
   0xc   : > { %p61_p7 = scmp.eq.s32.totalorder %s435_s10, 1  ;;  %p67_p8 = scmp.eq.s32.totalorder %s244_s11, 1 }
   0xd   : > { %p268_p10 = scmp.lt.s32.totalorder %s402_s9, 2  ;;  %s87_s20 = sand.u32 1, %s398_s8  }
   0xe   : > { %p464_p11 = por %p61_p7, %p31_p0  ;;  %p468_p12 = por %p67_p8, %p37_p3 }
   0xf   : > { %s248_s21 = sshll.u32 %s402_s9, 3  ;;  %s247_s22 = sshll.u32 %s87_s20, 3 }
  0x10   : > { %s95_s25 = scalar_lea.hbm %s541_s0, %s248_s21  ;;  %s91_s27 = scalar_lea.vmem [#allocation2], %s247_s22 }
  0x11   : > { %s97_s26 = sshll.u32 %s95_s25, 4  ;;  %s99_s28 = sshll.u32 %s91_s27, 4  ;;  %s98_s26 = int_to_ptr.hbm [resolvable:$true] %s97_s26  ;;  %s100_s28 = int_to_ptr.vmem [resolvable:$true] %s99_s28 }
  0x12   : > { %p479_p13 = pnand %p268_p10, %p453_p5  ;;  %p249_p0 = scmp.ge.s32.totalorder %s402_s9, 1 }
  0x13   : > { %p104_p1 = scmp.lt.s32.totalorder %s402_s9, 3  ;;  %s88_s30 = scalar_lea.sflag [#allocation3], %s87_s20 }
  0x14   : > { %s306_s2 = sshra.s32 %s98_s26, 4  ;;  %p310_p3 = pneg %p479_p13  ;;  %s307_s2 = int_to_ptr.hbm [resolvable:$true] %s306_s2 }
  0x15   : > { %s308_s3 = scalar_lea.hbm %s307_s2, 8  ;;  %s313_s11 = scalar_lea.hbm %s541_s0, 16 }
  0x16   : > { %p309_p2 = scmp.ne.s32.totalorder %s307_s2, %s308_s3  ;;  %p314_p5 = scmp.lt.s32.totalorder %s307_s2, %s541_s0 }
  0x17   : > { %p315_p8 = scmp.lt.s32.totalorder %s313_s11, %s308_s3 }
  0x18   : > { %p311_p4 = pnand %p310_p3, %p309_p2 }
  0x19   : > { %p316_p10 = por %p315_p8, %p314_p5 }
  0x1a   : > { %p312_p7 = pneg %p311_p4 }
  0x1c   : > { %p317_p9 = pnand %p316_p10, %p312_p7 }
  0x1e   : > { %320 = shalt.err (!%p317_p9)
}
  0x1f   : > { %263 = dma.hbm_to_vmem [thread:$0]  (!%p479_p13), %s98_s26, 128, %s100_s28, %s88_s30  }
  0x20   : > { %p105_p2 = pnand %p249_p0, %p104_p1 }
  0x21   : > { %s500_s16 = sand.u32 (!%p105_p2), 1, %s394_s7  }
  0x22   : > { %108 = sbr.rel (%p105_p2) target bundleno = 82 (0x52), region = 24  ;;  %s250_s20 = sshll.u32 (!%p105_p2), %s500_s16, 3 }
  0x23   : > { %s111_s21 = scalar_lea.sflag (!%p105_p2), [#allocation3], %s500_s16  ;;  %s114_s22 = scalar_lea.vmem (!%p105_p2), [#allocation2], %s250_s20 }
  0x27   : > { %381 = dma.done.wait (%p457_p6), %s111_s21, 128  }
  0x28   : > { %383 = vsyncadd (%p457_p6), %s111_s21, 4294967168  ;;  %v134_v0 = vld [vmem:[%s114_s22] sm:$0xff]  ;;  %s253_s17 = sshll.u32 %s435_s10, 3  ;;  %s133_s26 = scalar_lea.vmem [#allocation5], %s250_s20 }
  0x29   : > { %v135_v1 = vmul.f32 1.442695, %v134_v0  ;;  %s169_s25 = scalar_lea.hbm %s542_s1, %s253_s17  ;;  %s171_s27 = sshll.u32 %s133_s26, 4  ;;  %s172_s27 = int_to_ptr.vmem [resolvable:$true] %s171_s27 }
  0x2a   : > { %s173_s28 = sshll.u32 %s169_s25, 4  ;;  %s159_s29 = scalar_lea.sflag [#allocation4], %s500_s16  ;;  %s174_s28 = int_to_ptr.hbm [resolvable:$true] %s173_s28 }
  0x2b   : > { %302 = vpow2.f32 %v135_v1  ;;  %s350_s10 = sshra.s32 %s174_s28, 4  ;;  %s356_s4 = scalar_lea.hbm %s542_s1, 16  ;;  %s351_s10 = int_to_ptr.hbm [resolvable:$true] %s350_s10 }
  0x2c   : > { %s352_s30 = scalar_lea.hbm %s351_s10, 8  ;;  %p357_p0 = scmp.lt.s32.totalorder %s351_s10, %s542_s1 }
  0x2d   : > { %p353_p6 = scmp.ne.s32.totalorder %s351_s10, %s352_s30  ;;  %p358_p1 = scmp.lt.s32.totalorder %s356_s4, %s352_s30 }
  0x2f   : > { %p354_p9 = pnand %p353_p6, %p464_p11  ;;  %p359_p3 = por %p358_p1, %p357_p0 }
  0x31   : > { %v303_v2 = vpop.eup %302  ;;  %p355_p13 = pneg %p354_p9 }
  0x32   : > { %v137_v3 = vadd.f32 1.0, %v303_v2 }
  0x33   : > { %p360_p4 = pnand %p359_p3, %p355_p13 }
  0x34   : > { %v138_v4 = vmul.f32 %v137_v3, %v137_v3 }
  0x36   : > { %v139_v5 = vadd.f32 1.0, %v138_v4 }
  0x38   : > { %304 = vrcp.f32 %v139_v5  ;;  %v151_v8 = vand.u32 2147483648, %v139_v5  ;;  %vm145_vm0 = vweird.f32 %v139_v5  ;;  %v149_v10 = vand.u32 2147483647, %v139_v5 }
  0x3a   : > { %v152_v12 = vor.u32 1.1754944e-38, %v151_v8  ;;  %vm150_vm3 = vcmp.eq.f32.partialorder %v149_v10, 8.507059e+37 }
  0x3e   : > { %v305_v6 = vpop.eup %304 }
  0x3f   : > { %v141_v7 = vmul.f32 %v305_v6, %v139_v5  ;;  %vm146_vm1 = vweird.f32 %v305_v6 }
  0x40   : > { %vm147_vm2 = vmor %vm145_vm0, %vm146_vm1 }
  0x41   : > { %v142_v9 = vsub.f32 1.0, %v141_v7 }
  0x43   : > { %v143_v11 = vmul.f32 %v305_v6, %v142_v9 }
  0x45   : > { %v144_v13 = vadd.f32 %v305_v6, %v143_v11 }
  0x47   : > { %v148_v14 = vsel %vm147_vm2, %v305_v6, %v144_v13 }
  0x48   : > { %v153_v15 = vsel %vm150_vm3, %v152_v12, %v148_v14 }
  0x49   : > { %v154_v16 = vmul.f32 2.0, %v153_v15 }
  0x4b   : > { %v155_v17 = vsub.f32 1.0, %v154_v16 }
  0x4d   : > { %v156_v18 = vmul.f32 %v155_v17, %v134_v0 }
  0x4f   : > { %157 = vst [vmem:[%s133_s26] sm:$0xff] %v156_v18 }
  0x50   : > { %363 = shalt.err (!%p360_p4)
}
  0x51   : > { %258 = dma.vmem_to_hbm [thread:$0]  (%p464_p11), %s172_s27, 128, %s174_s28, %s159_s29  }
  0x52 PF: > { %s185_s13 = sand.u32 1, %s390_s6   ;;  %p548_p7 = scmp.ge.s32.totalorder %s402_s9, 2 }
  0x53   : > { %s186_s14 = scalar_lea.sflag [#allocation4], %s185_s13 }
  0x54   : > { %p265_p5 = pnand %p548_p7, %p468_p12 }
  0x56   : > { %p266_p8 = pneg %p265_p5 }
  0x58   : > { %385 = dma.done.wait (%p266_p8), %s186_s14, 128  }
  0x59   : > { %387 = vsyncadd (%p266_p8), %s186_s14, 4294967168  ;;  %p14_p10 = scmp.ge.s32.totalorder %s439_s12, 4   ;;  %s549_s6 = smov %s394_s7 }
  0x5a   : > { %s550_s7 = smov %s398_s8  ;;  %s551_s8 = smov %s451_s15 }
  0x5b   : > { %s552_s9 = smov %s439_s12  ;;  %16 = sbr.rel (!%p14_p10) target bundleno = 5 (0x5), region = 69 }
  0x60   :  { %192 = vsyncpa [#allocation3], 1 }
  0x61   :  { %194 = vsyncpa [#allocation3 + $0x1], 1 }
  0x62   :  { %195 = vsyncpa [#allocation4], 1 }
  0x63   :  { %197 = vsyncpa [#allocation4 + $0x1], 1 }

</bundles_post_ra>
